<compile_context>
chip_gen: v7x
topology: tpu7x:2x2x1
jax: 0.10.0
libtpu: 0.0.40
codegen_flags: <defaults>
</compile_context>

<pallas_src>
import functools

import jax
import jax.numpy as jnp
from jax.experimental import pallas as pl
from jax.experimental.pallas import tpu as pltpu


def _round_up(x, m):
    return ((x + m - 1) // m) * m


def _actor_kernel(x_ref, w1_ref, w2_ref, w3_ref, w4_ref, b_ref, out_ref, *,
                  state_dim, state_pad, mid_pad, act_pad, act_dim):
    """One batch tile through the full 4-layer MLP (bf16 MXU, fp32 epilogue)."""
    cdt = jnp.bfloat16

    # Load the raw (tb, state_dim) tile, cast to bf16 and zero-pad the feature
    # axis to the lane-aligned width *inside VMEM* (no padded HBM input copy).
    # Padding with explicit zeros keeps padded-column math exact (0 * w = 0).
    x = x_ref[...].astype(cdt)
    if state_pad > state_dim:
        x = jnp.concatenate(
            [x, jnp.zeros((x.shape[0], state_pad - state_dim), cdt)], axis=1)

    # Linear 1 + ReLU
    z1 = jnp.dot(x, w1_ref[...], preferred_element_type=jnp.float32)
    z1 = z1 + b_ref[0:1, :mid_pad]
    h1 = jnp.maximum(z1, 0.0).astype(cdt)

    # Linear 2 + ReLU
    z2 = jnp.dot(h1, w2_ref[...], preferred_element_type=jnp.float32)
    z2 = z2 + b_ref[1:2, :mid_pad]
    h2 = jnp.maximum(z2, 0.0).astype(cdt)

    # Linear 3 + Hardswish: x * relu6(x + 3) / 6
    z3 = jnp.dot(h2, w3_ref[...], preferred_element_type=jnp.float32)
    z3 = z3 + b_ref[2:3, :mid_pad]
    h3 = (z3 * jnp.clip(z3 + 3.0, 0.0, 6.0) * (1.0 / 6.0)).astype(cdt)

    # Linear 4 + tanh; only the real action columns are computed through tanh
    # and stored (narrow masked store; batch-padded rows are dropped on store).
    z4 = jnp.dot(h3, w4_ref[...], preferred_element_type=jnp.float32)
    z4 = z4 + b_ref[3:4, :act_pad]
    out_ref[...] = jnp.tanh(z4[:, :act_dim])


class PallasActor:
    """Pallas-TPU equivalent of the PyTorch Actor forward pass."""

    def __init__(self, params, state_dim, mid_dim, action_dim,
                 max_batch_tile=1024):
        self.state_dim = int(state_dim)
        self.mid_dim = int(mid_dim)
        self.action_dim = int(action_dim)
        # Batch tile: sublane-aligned; sweep 512-2048 on real workloads.
        self.max_batch_tile = max(8, _round_up(int(max_batch_tile), 8))

        # Lane-aligned (128) feature dims for the MXU (never shrink below 128).
        sp = _round_up(self.state_dim, 128)
        mp = _round_up(self.mid_dim, 128)
        ap = _round_up(self.action_dim, 128)
        self.state_pad, self.mid_pad, self.act_pad = sp, mp, ap

        def prep_w(w, in_pad, out_pad):
            # PyTorch layout [out, in] -> transposed [in, out], zero-padded, bf16.
            wt = jnp.asarray(w, jnp.float32).T
            wt = jnp.pad(wt, ((0, in_pad - wt.shape[0]), (0, out_pad - wt.shape[1])))
            return wt.astype(jnp.bfloat16)

        # Done ONCE here (not per forward call).
        self.w1 = prep_w(params["w1"], sp, mp)
        self.w2 = prep_w(params["w2"], mp, mp)
        self.w3 = prep_w(params["w3"], mp, mp)
        self.w4 = prep_w(params["w4"], mp, ap)

        # Pack the four biases into a single padded [4, P] fp32 array
        # (one small DMA instead of four tiny ones).
        P = max(mp, ap)
        b = jnp.zeros((4, P), jnp.float32)
        b = b.at[0, :self.mid_dim].set(jnp.asarray(params["b1"], jnp.float32))
        b = b.at[1, :self.mid_dim].set(jnp.asarray(params["b2"], jnp.float32))
        b = b.at[2, :self.mid_dim].set(jnp.asarray(params["b3"], jnp.float32))
        b = b.at[3, :self.action_dim].set(jnp.asarray(params["b4"], jnp.float32))
        self.b_packed = b
        self.bias_pad = P

        self._fwd = jax.jit(self._forward,
                            static_argnames=("single_buffer_weights",))
        self._single_buffer = None  # resolved on first call

    # ------------------------------------------------------------------ tiles
    def _batch_tile(self, B):
        # Large tiles amortize the ~0.35us per-grid-step overhead.
        tb = B if B <= self.max_batch_tile else self.max_batch_tile
        # v7x has 2 TensorCores: for big batches keep >=2 "parallel" grid steps
        # so both cores (and both DMA engines) get work.
        if B > 256 and pl.cdiv(B, tb) < 2:
            tb = _round_up(pl.cdiv(B, 2), 8)
        return tb

    # ---------------------------------------------------------------- forward
    def _forward(self, state, w1, w2, w3, w4, b_packed, *,
                 single_buffer_weights):
        B = state.shape[0]
        sp, mp, ap, P = self.state_pad, self.mid_pad, self.act_pad, self.bias_pad
        sd, ad = self.state_dim, self.action_dim

        tb = self._batch_tile(B)
        grid_b = pl.cdiv(B, tb)

        kernel = functools.partial(_actor_kernel, state_dim=sd, state_pad=sp,
                                   mid_pad=mp, act_pad=ap, act_dim=ad)

        # Constant-index weight/bias blocks never change across the grid ->
        # single-buffer them; streamed activations keep default double buffering.
        if single_buffer_weights:
            def const_spec(shape):
                return pl.BlockSpec(shape, lambda i: (0, 0),
                                    pipeline_mode=pl.Buffered(1))
        else:
            def const_spec(shape):
                return pl.BlockSpec(shape, lambda i: (0, 0))

        w_bytes = 2 * (sp * mp + 2 * mp * mp + mp * ap)      # bf16 weights
        b_bytes = 4 * 4 * P                                   # fp32 packed biases
        n_wbuf = 1 if single_buffer_weights else 2
        vmem_est = (n_wbuf * (w_bytes + b_bytes)
                    + 2 * tb * sd * state.dtype.itemsize      # streamed x tiles
                    + 2 * tb * ad * 4                         # output tiles
                    + 10 * tb * max(sp, mp, ap) * 4)          # in-kernel temporaries
        vmem_limit = int(max(32 * 1024 * 1024,
                             min(1.25 * vmem_est, 100 * 1024 * 1024)))

        rows = grid_b * tb
        flops = 2 * rows * (sp * mp + 2 * mp * mp + mp * ap)
        bytes_accessed = (B * sd * state.dtype.itemsize       # unpadded input
                          + w_bytes + b_bytes                 # resident params
                          + B * ad * 4)                       # narrow fp32 output
        cost = pl.CostEstimate(flops=flops, transcendentals=rows * ap,
                               bytes_accessed=bytes_accessed)

        return pl.pallas_call(
            kernel,
            out_shape=jax.ShapeDtypeStruct((B, ad), jnp.float32),
            grid=(grid_b,),
            in_specs=[
                # Unpadded activations, streamed & auto-pipelined over the batch
                # (full-extent last dim; partial last block rows are masked).
                pl.BlockSpec((tb, sd), lambda i: (i, 0)),
                const_spec((sp, mp)),      # VMEM-resident weights
                const_spec((mp, mp)),
                const_spec((mp, mp)),
                const_spec((mp, ap)),
                const_spec((4, P)),        # packed biases
            ],
            # Narrow, exact-shape output: no 128-lane fp32 writeback and no
            # post-kernel slice pass.
            out_specs=pl.BlockSpec((tb, ad), lambda i: (i, 0)),
            compiler_params=pltpu.CompilerParams(
                dimension_semantics=("parallel",),
                vmem_limit_bytes=vmem_limit),
            cost_estimate=cost,
        )(state, w1, w2, w3, w4, b_packed)

    def __call__(self, state):
        args = (state, self.w1, self.w2, self.w3, self.w4, self.b_packed)
        if self._single_buffer is None:
            try:
                out = self._fwd(*args, single_buffer_weights=True)
                self._single_buffer = True
                return out
            except Exception:
                # pl.Buffered(1) not accepted by this JAX build; fall back to
                # default double-buffered weight blocks (identical semantics).
                self._single_buffer = False
        return self._fwd(*args, single_buffer_weights=self._single_buffer)


def init_params(key, state_dim, mid_dim, action_dim):
    """Deterministic synthetic init (PyTorch-style uniform fan-in scaling, W=[out,in])."""
    dims = [(mid_dim, state_dim), (mid_dim, mid_dim), (mid_dim, mid_dim),
            (action_dim, mid_dim)]
    params = {}
    for i, (out_d, in_d) in enumerate(dims, start=1):
        key, kw, kb = jax.random.split(key, 3)
        bound = 1.0 / jnp.sqrt(in_d)
        params[f"w{i}"] = jax.random.uniform(kw, (out_d, in_d), jnp.float32, -bound, bound)
        params[f"b{i}"] = jax.random.uniform(kb, (out_d,), jnp.float32, -bound, bound)
    return params


def actor_forward_ref(state, params):
    """Pure-JAX fp32 reference for correctness check."""
    h = jnp.maximum(state @ params["w1"].T + params["b1"], 0.0)
    h = jnp.maximum(h @ params["w2"].T + params["b2"], 0.0)
    z = h @ params["w3"].T + params["b3"]
    h = z * jnp.clip(z + 3.0, 0.0, 6.0) / 6.0
    return jnp.tanh(h @ params["w4"].T + params["b4"])


if __name__ == "__main__":
    B, state_dim, mid_dim, action_dim = 2, 16, 32, 4

    key = jax.random.PRNGKey(0)
    key, ks = jax.random.split(key)
    state = jax.random.normal(ks, (B, state_dim), jnp.float32)
    params = init_params(key, state_dim, mid_dim, action_dim)

    actor = PallasActor(params, state_dim, mid_dim, action_dim)
    out = jax.block_until_ready(actor(state))

    ref = actor_forward_ref(state, params)
    assert out.shape == (B, action_dim), out.shape
    # bf16 MXU operands (fp32 accumulation) -> slightly looser tolerance than a
    # pure-fp32 reference; this is a documented precision choice, not a bug.
    max_err = float(jnp.max(jnp.abs(out - ref)))
    assert jnp.allclose(out, ref, atol=3e-2, rtol=3e-2), f"mismatch vs reference: {max_err}"

    # TODO(synk): get_action() adds clamped Gaussian exploration noise
    # (randn_like*std, clamp) at inference time; it is plain host-side sampling
    # and is intentionally not part of the kernel.
    print("KERNEL_OK")
</pallas_src>

<mosaic_0001>
module attributes {stable_mosaic.version = 11 : i64} {
  func.func @_actor_kernel(%arg0: i32, %arg1: memref<2x16xf32, #tpu.memory_space<vmem>>, %arg2: memref<128x128xbf16, #tpu.memory_space<vmem>>, %arg3: memref<128x128xbf16, #tpu.memory_space<vmem>>, %arg4: memref<128x128xbf16, #tpu.memory_space<vmem>>, %arg5: memref<128x128xbf16, #tpu.memory_space<vmem>>, %arg6: memref<4x128xf32, #tpu.memory_space<vmem>>, %arg7: memref<2x4xf32, #tpu.memory_space<vmem>>) attributes {dimension_semantics = [#tpu.dimension_semantics<parallel>], iteration_bounds = array<i64: 1>, scalar_prefetch = 0 : i64, scratch_operands = 0 : i64, tpu.core_type = #tpu.core_type<tc>, window_params = [{transform_indices = @transform_0, window_bounds = array<i64: 2, 16>}, {pipeline_mode = #tpu.pipeline_mode<synchronous>, transform_indices = @transform_1, window_bounds = array<i64: 128, 128>}, {pipeline_mode = #tpu.pipeline_mode<synchronous>, transform_indices = @transform_2, window_bounds = array<i64: 128, 128>}, {pipeline_mode = #tpu.pipeline_mode<synchronous>, transform_indices = @transform_3, window_bounds = array<i64: 128, 128>}, {pipeline_mode = #tpu.pipeline_mode<synchronous>, transform_indices = @transform_4, window_bounds = array<i64: 128, 128>}, {pipeline_mode = #tpu.pipeline_mode<synchronous>, transform_indices = @transform_5, window_bounds = array<i64: 4, 128>}, {transform_indices = @transform_6, window_bounds = array<i64: 2, 4>}]} {
    %c0 = arith.constant 0 : index
    %c0_0 = arith.constant 0 : index
    %0 = vector.load %arg1[%c0, %c0_0] : memref<2x16xf32, #tpu.memory_space<vmem>>, vector<2x16xf32>
    %1 = arith.truncf %0 : vector<2x16xf32> to vector<2x16xbf16>
    %cst = arith.constant 0.000000e+00 : bf16
    %2 = vector.broadcast %cst : bf16 to vector<2x112xbf16>
    %3 = tpu.concatenate %1, %2 in 1 : vector<2x16xbf16>, vector<2x112xbf16> -> vector<2x128xbf16>
    %c0_1 = arith.constant 0 : index
    %c0_2 = arith.constant 0 : index
    %4 = vector.load %arg2[%c0_1, %c0_2] : memref<128x128xbf16, #tpu.memory_space<vmem>>, vector<128x128xbf16>
    %cst_3 = arith.constant dense<0.000000e+00> : vector<2x128xf32>
    %5 = tpu.matmul %3, %4, %cst_3 {dimension_numbers = #tpu.dot_dimension_numbers<[1], [0], [0], [1], [0, 0, 1, 1], [], []>} : vector<2x128xbf16>, vector<128x128xbf16>, vector<2x128xf32> -> vector<2x128xf32>
    %c0_4 = arith.constant 0 : index
    %c0_5 = arith.constant 0 : index
    %6 = vector.load %arg6[%c0_4, %c0_5] : memref<4x128xf32, #tpu.memory_space<vmem>>, vector<1x128xf32>
    %7 = vector.broadcast %6 : vector<1x128xf32> to vector<2x128xf32>
    %8 = arith.addf %5, %7 : vector<2x128xf32>
    %cst_6 = arith.constant 0.000000e+00 : f32
    %9 = vector.broadcast %cst_6 : f32 to vector<2x128xf32>
    %10 = arith.maximumf %8, %9 : vector<2x128xf32>
    %11 = arith.truncf %10 : vector<2x128xf32> to vector<2x128xbf16>
    %c0_7 = arith.constant 0 : index
    %c0_8 = arith.constant 0 : index
    %12 = vector.load %arg3[%c0_7, %c0_8] : memref<128x128xbf16, #tpu.memory_space<vmem>>, vector<128x128xbf16>
    %cst_9 = arith.constant dense<0.000000e+00> : vector<2x128xf32>
    %13 = tpu.matmul %11, %12, %cst_9 {dimension_numbers = #tpu.dot_dimension_numbers<[1], [0], [0], [1], [0, 0, 1, 1], [], []>} : vector<2x128xbf16>, vector<128x128xbf16>, vector<2x128xf32> -> vector<2x128xf32>
    %c1 = arith.constant 1 : index
    %c0_10 = arith.constant 0 : index
    %14 = vector.load %arg6[%c1, %c0_10] : memref<4x128xf32, #tpu.memory_space<vmem>>, vector<1x128xf32>
    %15 = vector.broadcast %14 : vector<1x128xf32> to vector<2x128xf32>
    %16 = arith.addf %13, %15 : vector<2x128xf32>
    %cst_11 = arith.constant 0.000000e+00 : f32
    %17 = vector.broadcast %cst_11 : f32 to vector<2x128xf32>
    %18 = arith.maximumf %16, %17 : vector<2x128xf32>
    %19 = arith.truncf %18 : vector<2x128xf32> to vector<2x128xbf16>
    %c0_12 = arith.constant 0 : index
    %c0_13 = arith.constant 0 : index
    %20 = vector.load %arg4[%c0_12, %c0_13] : memref<128x128xbf16, #tpu.memory_space<vmem>>, vector<128x128xbf16>
    %cst_14 = arith.constant dense<0.000000e+00> : vector<2x128xf32>
    %21 = tpu.matmul %19, %20, %cst_14 {dimension_numbers = #tpu.dot_dimension_numbers<[1], [0], [0], [1], [0, 0, 1, 1], [], []>} : vector<2x128xbf16>, vector<128x128xbf16>, vector<2x128xf32> -> vector<2x128xf32>
    %c2 = arith.constant 2 : index
    %c0_15 = arith.constant 0 : index
    %22 = vector.load %arg6[%c2, %c0_15] : memref<4x128xf32, #tpu.memory_space<vmem>>, vector<1x128xf32>
    %23 = vector.broadcast %22 : vector<1x128xf32> to vector<2x128xf32>
    %24 = arith.addf %21, %23 : vector<2x128xf32>
    %cst_16 = arith.constant 3.000000e+00 : f32
    %25 = vector.broadcast %cst_16 : f32 to vector<2x128xf32>
    %26 = arith.addf %24, %25 : vector<2x128xf32>
    %cst_17 = arith.constant 0.000000e+00 : f32
    %cst_18 = arith.constant 6.000000e+00 : f32
    %27 = vector.broadcast %cst_17 : f32 to vector<2x128xf32>
    %28 = arith.maximumf %27, %26 : vector<2x128xf32>
    %29 = vector.broadcast %cst_18 : f32 to vector<2x128xf32>
    %30 = arith.minimumf %29, %28 : vector<2x128xf32>
    %31 = arith.mulf %24, %30 : vector<2x128xf32>
    %cst_19 = arith.constant 0.166666672 : f32
    %32 = vector.broadcast %cst_19 : f32 to vector<2x128xf32>
    %33 = arith.mulf %31, %32 : vector<2x128xf32>
    %34 = arith.truncf %33 : vector<2x128xf32> to vector<2x128xbf16>
    %c0_20 = arith.constant 0 : index
    %c0_21 = arith.constant 0 : index
    %35 = vector.load %arg5[%c0_20, %c0_21] : memref<128x128xbf16, #tpu.memory_space<vmem>>, vector<128x128xbf16>
    %cst_22 = arith.constant dense<0.000000e+00> : vector<2x128xf32>
    %36 = tpu.matmul %34, %35, %cst_22 {dimension_numbers = #tpu.dot_dimension_numbers<[1], [0], [0], [1], [0, 0, 1, 1], [], []>} : vector<2x128xbf16>, vector<128x128xbf16>, vector<2x128xf32> -> vector<2x128xf32>
    %c3 = arith.constant 3 : index
    %c0_23 = arith.constant 0 : index
    %37 = vector.load %arg6[%c3, %c0_23] : memref<4x128xf32, #tpu.memory_space<vmem>>, vector<1x128xf32>
    %38 = vector.broadcast %37 : vector<1x128xf32> to vector<2x128xf32>
    %39 = arith.addf %36, %38 : vector<2x128xf32>
    %40 = vector.extract_strided_slice %39 {offsets = [0, 0], sizes = [2, 4], strides = [1, 1]} : vector<2x128xf32> to vector<2x4xf32>
    %41 = math.tanh %40 : vector<2x4xf32>
    %c0_24 = arith.constant 0 : index
    %c0_25 = arith.constant 0 : index
    %42 = vector.load %arg7[%c0_24, %c0_25] : memref<2x4xf32, #tpu.memory_space<vmem>>, vector<2x4xf32>
    tpu.vector_store %arg7[%c0_24, %c0_25], %41 {strides = array<i32>} : memref<2x4xf32, #tpu.memory_space<vmem>>, vector<2x4xf32>,
    return
  }
  func.func @transform_0(%arg0: i32) -> (i32, i32) {
    %c0_i32 = arith.constant 0 : i32
    %c0_i32_0 = arith.constant 0 : i32
    return %arg0, %c0_i32 : i32, i32
  }
  func.func @transform_1(%arg0: i32) -> (i32, i32) {
    %c0_i32 = arith.constant 0 : i32
    %c0_i32_0 = arith.constant 0 : i32
    %c0_i32_1 = arith.constant 0 : i32
    return %c0_i32, %c0_i32_0 : i32, i32
  }
  func.func @transform_2(%arg0: i32) -> (i32, i32) {
    %c0_i32 = arith.constant 0 : i32
    %c0_i32_0 = arith.constant 0 : i32
    %c0_i32_1 = arith.constant 0 : i32
    return %c0_i32, %c0_i32_0 : i32, i32
  }
  func.func @transform_3(%arg0: i32) -> (i32, i32) {
    %c0_i32 = arith.constant 0 : i32
    %c0_i32_0 = arith.constant 0 : i32
    %c0_i32_1 = arith.constant 0 : i32
    return %c0_i32, %c0_i32_0 : i32, i32
  }
  func.func @transform_4(%arg0: i32) -> (i32, i32) {
    %c0_i32 = arith.constant 0 : i32
    %c0_i32_0 = arith.constant 0 : i32
    %c0_i32_1 = arith.constant 0 : i32
    return %c0_i32, %c0_i32_0 : i32, i32
  }
  func.func @transform_5(%arg0: i32) -> (i32, i32) {
    %c0_i32 = arith.constant 0 : i32
    %c0_i32_0 = arith.constant 0 : i32
    %c0_i32_1 = arith.constant 0 : i32
    return %c0_i32, %c0_i32_0 : i32, i32
  }
  func.func @transform_6(%arg0: i32) -> (i32, i32) {
    %c0_i32 = arith.constant 0 : i32
    %c0_i32_0 = arith.constant 0 : i32
    return %arg0, %c0_i32 : i32, i32
  }
}

module attributes {stable_mosaic.version = 11 : i64} {
  func.func @_actor_kernel(%arg0: i32, %arg1: memref<2x16xf32, #tpu.memory_space<vmem>>, %arg2: memref<128x128xbf16, #tpu.memory_space<vmem>>, %arg3: memref<128x128xbf16, #tpu.memory_space<vmem>>, %arg4: memref<128x128xbf16, #tpu.memory_space<vmem>>, %arg5: memref<128x128xbf16, #tpu.memory_space<vmem>>, %arg6: memref<4x128xf32, #tpu.memory_space<vmem>>, %arg7: memref<2x4xf32, #tpu.memory_space<vmem>>) attributes {dimension_semantics = [#tpu.dimension_semantics<parallel>], iteration_bounds = array<i64: 1>, scalar_prefetch = 0 : i64, scratch_operands = 0 : i64, tpu.core_type = #tpu.core_type<tc>, window_params = [{transform_indices = @transform_0, window_bounds = array<i64: 2, 16>}, {pipeline_mode = #tpu.pipeline_mode<synchronous>, transform_indices = @transform_1, window_bounds = array<i64: 128, 128>}, {pipeline_mode = #tpu.pipeline_mode<synchronous>, transform_indices = @transform_2, window_bounds = array<i64: 128, 128>}, {pipeline_mode = #tpu.pipeline_mode<synchronous>, transform_indices = @transform_3, window_bounds = array<i64: 128, 128>}, {pipeline_mode = #tpu.pipeline_mode<synchronous>, transform_indices = @transform_4, window_bounds = array<i64: 128, 128>}, {pipeline_mode = #tpu.pipeline_mode<synchronous>, transform_indices = @transform_5, window_bounds = array<i64: 4, 128>}, {transform_indices = @transform_6, window_bounds = array<i64: 2, 4>}]} {
    %c0 = arith.constant 0 : index
    %c0_0 = arith.constant 0 : index
    %0 = vector.load %arg1[%c0, %c0_0] : memref<2x16xf32, #tpu.memory_space<vmem>>, vector<2x16xf32>
    %1 = arith.truncf %0 : vector<2x16xf32> to vector<2x16xbf16>
    %cst = arith.constant 0.000000e+00 : bf16
    %2 = vector.broadcast %cst : bf16 to vector<2x112xbf16>
    %3 = tpu.concatenate %1, %2 in 1 : vector<2x16xbf16>, vector<2x112xbf16> -> vector<2x128xbf16>
    %c0_1 = arith.constant 0 : index
    %c0_2 = arith.constant 0 : index
    %4 = vector.load %arg2[%c0_1, %c0_2] : memref<128x128xbf16, #tpu.memory_space<vmem>>, vector<128x128xbf16>
    %cst_3 = arith.constant dense<0.000000e+00> : vector<2x128xf32>
    %5 = tpu.matmul %3, %4, %cst_3 {dimension_numbers = #tpu.dot_dimension_numbers<[1], [0], [0], [1], [0, 0, 1, 1], [], []>} : vector<2x128xbf16>, vector<128x128xbf16>, vector<2x128xf32> -> vector<2x128xf32>
    %c0_4 = arith.constant 0 : index
    %c0_5 = arith.constant 0 : index
    %6 = vector.load %arg6[%c0_4, %c0_5] : memref<4x128xf32, #tpu.memory_space<vmem>>, vector<1x128xf32>
    %7 = vector.broadcast %6 : vector<1x128xf32> to vector<2x128xf32>
    %8 = arith.addf %5, %7 : vector<2x128xf32>
    %cst_6 = arith.constant 0.000000e+00 : f32
    %9 = vector.broadcast %cst_6 : f32 to vector<2x128xf32>
    %10 = arith.maximumf %8, %9 : vector<2x128xf32>
    %11 = arith.truncf %10 : vector<2x128xf32> to vector<2x128xbf16>
    %c0_7 = arith.constant 0 : index
    %c0_8 = arith.constant 0 : index
    %12 = vector.load %arg3[%c0_7, %c0_8] : memref<128x128xbf16, #tpu.memory_space<vmem>>, vector<128x128xbf16>
    %cst_9 = arith.constant dense<0.000000e+00> : vector<2x128xf32>
    %13 = tpu.matmul %11, %12, %cst_9 {dimension_numbers = #tpu.dot_dimension_numbers<[1], [0], [0], [1], [0, 0, 1, 1], [], []>} : vector<2x128xbf16>, vector<128x128xbf16>, vector<2x128xf32> -> vector<2x128xf32>
    %c1 = arith.constant 1 : index
    %c0_10 = arith.constant 0 : index
    %14 = vector.load %arg6[%c1, %c0_10] : memref<4x128xf32, #tpu.memory_space<vmem>>, vector<1x128xf32>
    %15 = vector.broadcast %14 : vector<1x128xf32> to vector<2x128xf32>
    %16 = arith.addf %13, %15 : vector<2x128xf32>
    %cst_11 = arith.constant 0.000000e+00 : f32
    %17 = vector.broadcast %cst_11 : f32 to vector<2x128xf32>
    %18 = arith.maximumf %16, %17 : vector<2x128xf32>
    %19 = arith.truncf %18 : vector<2x128xf32> to vector<2x128xbf16>
    %c0_12 = arith.constant 0 : index
    %c0_13 = arith.constant 0 : index
    %20 = vector.load %arg4[%c0_12, %c0_13] : memref<128x128xbf16, #tpu.memory_space<vmem>>, vector<128x128xbf16>
    %cst_14 = arith.constant dense<0.000000e+00> : vector<2x128xf32>
    %21 = tpu.matmul %19, %20, %cst_14 {dimension_numbers = #tpu.dot_dimension_numbers<[1], [0], [0], [1], [0, 0, 1, 1], [], []>} : vector<2x128xbf16>, vector<128x128xbf16>, vector<2x128xf32> -> vector<2x128xf32>
    %c2 = arith.constant 2 : index
    %c0_15 = arith.constant 0 : index
    %22 = vector.load %arg6[%c2, %c0_15] : memref<4x128xf32, #tpu.memory_space<vmem>>, vector<1x128xf32>
    %23 = vector.broadcast %22 : vector<1x128xf32> to vector<2x128xf32>
    %24 = arith.addf %21, %23 : vector<2x128xf32>
    %cst_16 = arith.constant 3.000000e+00 : f32
    %25 = vector.broadcast %cst_16 : f32 to vector<2x128xf32>
    %26 = arith.addf %24, %25 : vector<2x128xf32>
    %cst_17 = arith.constant 0.000000e+00 : f32
    %cst_18 = arith.constant 6.000000e+00 : f32
    %27 = vector.broadcast %cst_17 : f32 to vector<2x128xf32>
    %28 = arith.maximumf %27, %26 : vector<2x128xf32>
    %29 = vector.broadcast %cst_18 : f32 to vector<2x128xf32>
    %30 = arith.minimumf %29, %28 : vector<2x128xf32>
    %31 = arith.mulf %24, %30 : vector<2x128xf32>
    %cst_19 = arith.constant 0.166666672 : f32
    %32 = vector.broadcast %cst_19 : f32 to vector<2x128xf32>
    %33 = arith.mulf %31, %32 : vector<2x128xf32>
    %34 = arith.truncf %33 : vector<2x128xf32> to vector<2x128xbf16>
    %c0_20 = arith.constant 0 : index
    %c0_21 = arith.constant 0 : index
    %35 = vector.load %arg5[%c0_20, %c0_21] : memref<128x128xbf16, #tpu.memory_space<vmem>>, vector<128x128xbf16>
    %cst_22 = arith.constant dense<0.000000e+00> : vector<2x128xf32>
    %36 = tpu.matmul %34, %35, %cst_22 {dimension_numbers = #tpu.dot_dimension_numbers<[1], [0], [0], [1], [0, 0, 1, 1], [], []>} : vector<2x128xbf16>, vector<128x128xbf16>, vector<2x128xf32> -> vector<2x128xf32>
    %c3 = arith.constant 3 : index
    %c0_23 = arith.constant 0 : index
    %37 = vector.load %arg6[%c3, %c0_23] : memref<4x128xf32, #tpu.memory_space<vmem>>, vector<1x128xf32>
    %38 = vector.broadcast %37 : vector<1x128xf32> to vector<2x128xf32>
    %39 = arith.addf %36, %38 : vector<2x128xf32>
    %40 = vector.extract_strided_slice %39 {offsets = [0, 0], sizes = [2, 4], strides = [1, 1]} : vector<2x128xf32> to vector<2x4xf32>
    %41 = math.tanh %40 : vector<2x4xf32>
    %c0_24 = arith.constant 0 : index
    %c0_25 = arith.constant 0 : index
    %42 = vector.load %arg7[%c0_24, %c0_25] : memref<2x4xf32, #tpu.memory_space<vmem>>, vector<2x4xf32>
    tpu.vector_store %arg7[%c0_24, %c0_25], %41 {strides = array<i32>} : memref<2x4xf32, #tpu.memory_space<vmem>>, vector<2x4xf32>,
    return
  }
  func.func @transform_0(%arg0: i32) -> (i32, i32) {
    %c0_i32 = arith.constant 0 : i32
    %c0_i32_0 = arith.constant 0 : i32
    return %arg0, %c0_i32 : i32, i32
  }
  func.func @transform_1(%arg0: i32) -> (i32, i32) {
    %c0_i32 = arith.constant 0 : i32
    %c0_i32_0 = arith.constant 0 : i32
    %c0_i32_1 = arith.constant 0 : i32
    return %c0_i32, %c0_i32_0 : i32, i32
  }
  func.func @transform_2(%arg0: i32) -> (i32, i32) {
    %c0_i32 = arith.constant 0 : i32
    %c0_i32_0 = arith.constant 0 : i32
    %c0_i32_1 = arith.constant 0 : i32
    return %c0_i32, %c0_i32_0 : i32, i32
  }
  func.func @transform_3(%arg0: i32) -> (i32, i32) {
    %c0_i32 = arith.constant 0 : i32
    %c0_i32_0 = arith.constant 0 : i32
    %c0_i32_1 = arith.constant 0 : i32
    return %c0_i32, %c0_i32_0 : i32, i32
  }
  func.func @transform_4(%arg0: i32) -> (i32, i32) {
    %c0_i32 = arith.constant 0 : i32
    %c0_i32_0 = arith.constant 0 : i32
    %c0_i32_1 = arith.constant 0 : i32
    return %c0_i32, %c0_i32_0 : i32, i32
  }
  func.func @transform_5(%arg0: i32) -> (i32, i32) {
    %c0_i32 = arith.constant 0 : i32
    %c0_i32_0 = arith.constant 0 : i32
    %c0_i32_1 = arith.constant 0 : i32
    return %c0_i32, %c0_i32_0 : i32, i32
  }
  func.func @transform_6(%arg0: i32) -> (i32, i32) {
    %c0_i32 = arith.constant 0 : i32
    %c0_i32_0 = arith.constant 0 : i32
    return %arg0, %c0_i32 : i32, i32
  }
}

</mosaic_0001>

<bundles_post_ra>
// kernel: _forward.1
= control target key start
LH: loop header
LB: loop body
LE: loop exit
PB: predicated region body
PF: predicated region fallthrough
CT: control target
= control target key end

     0   :  { %11 = vsyncpa [#allocation3], 0  ;;  %s1082_s0 = inlined_call_operand.hbm [shape: f32[2,16], index: 0, kind: input, shape index: {}]   ;;  %s1083_s1 = inlined_call_operand.hbm [shape: bf16[128,128], index: 1, kind: input, shape index: {}]   ;;  %s1084_s2 = inlined_call_operand.hbm [shape: bf16[128,128], index: 2, kind: input, shape index: {}]   ;;  %s1085_s3 = inlined_call_operand.hbm [shape: bf16[128,128], index: 3, kind: input, shape index: {}]   ;;  %s1086_s4 = inlined_call_operand.hbm [shape: bf16[128,128], index: 4, kind: input, shape index: {}]   ;;  %s1087_s5 = inlined_call_operand.vmem [shape: f32[4,128], index: 5, kind: input, shape index: {}]   ;;  %s1088_s6 = inlined_call_operand.hbm [shape: f32[2,4], index: 6, kind: output, shape index: {}]  }
   0x1   :  { %12 = vsyncpa [#allocation6], 0 }
   0x2   :  { %13 = vsyncpa [#allocation9], 0 }
   0x3   :  { %14 = vsyncpa [#allocation4], 0  ;;  %s901_s21 = smov [#allocation5]   ;;  %s761_s25 = scalar_lea.hbm %s1083_s1, 1024 }
   0x4   :  { %s30_s22 = sshll.u32 %s901_s21, 4  ;;  %p762_p0 = scmp.ne.s32.totalorder %s1083_s1, %s761_s25  ;;  %s31_s22 = int_to_ptr.vmem [resolvable:$true] %s30_s22 }
   0x5   :  { %p765_p1 = scmp.lt.u32.totalorder %s761_s25, %s1083_s1 }
   0x7   :  { %p767_p2 = pnand %p765_p1, %p762_p0 }
   0x9   :  { %770 = shalt.err (!%p767_p2)
}
   0xa   :  { %s771_s30 = scalar_lea.vmem %s31_s22, 1024  ;;  %p776_p4 = scmp.lt.s32.totalorder %s31_s22, %s31_s22 }
   0xb   :  { %p772_p3 = scmp.ne.s32.totalorder %s31_s22, %s771_s30  ;;  %p777_p5 = scmp.lt.s32.totalorder %s771_s30, %s771_s30 }
   0xd   :  { %p778_p6 = por %p777_p5, %p776_p4 }
   0xf   :  { %p779_p7 = pnand %p778_p6, %p772_p3 }
  0x11   :  { %782 = shalt.err (!%p779_p7)
}
  0x12   :  { %s902_s7 = smov 64   ;;  %s903_s8 = smov 4  }
  0x13   :  { %36 = dma.hbm_to_vmem [thread:$0]  %s1083_s1, 1024, %s31_s22, [#allocation6], %s902_s7, %s902_s7, %s903_s8  }
  0x14   :  { %s904_s11 = smov [#allocation8]   ;;  %s905_s13 = smov [#allocation2]  }
  0x15   :  { %s54_s12 = sshll.u32 %s904_s11, 4  ;;  %s21_s14 = sshll.u32 %s905_s13, 4  ;;  %s55_s12 = int_to_ptr.vmem [resolvable:$true] %s54_s12  ;;  %s22_s14 = int_to_ptr.vmem [resolvable:$true] %s21_s14 }
  0x16   :  { %s783_s17 = scalar_lea.hbm %s1085_s3, 1024 }
  0x17   :  { %p784_p8 = scmp.ne.s32.totalorder %s1085_s3, %s783_s17  ;;  %p787_p9 = scmp.lt.u32.totalorder %s783_s17, %s1085_s3 }
  0x19   :  { %p789_p10 = pnand %p787_p9, %p784_p8 }
  0x1b   :  { %792 = shalt.err (!%p789_p10)
}
  0x1c   :  { %s793_s1 = scalar_lea.vmem %s55_s12, 1024  ;;  %p798_p12 = scmp.lt.s32.totalorder %s55_s12, %s55_s12 }
  0x1d   :  { %p794_p11 = scmp.ne.s32.totalorder %s55_s12, %s793_s1  ;;  %p799_p13 = scmp.lt.s32.totalorder %s793_s1, %s793_s1 }
  0x1f   :  { %p800_p0 = por %p799_p13, %p798_p12 }
  0x21   :  { %p801_p1 = pnand %p800_p0, %p794_p11 }
  0x23   :  { %804 = shalt.err (!%p801_p1)
}
  0x24   :  { %60 = dma.hbm_to_vmem [thread:$0]  %s1085_s3, 1024, %s55_s12, [#allocation9], %s902_s7, %s902_s7, %s903_s8  }
  0x25   :  { %s805_s26 = scalar_lea.hbm %s1082_s0, 32 }
  0x26   :  { %p806_p2 = scmp.ne.s32.totalorder %s1082_s0, %s805_s26  ;;  %p809_p3 = scmp.lt.u32.totalorder %s805_s26, %s1082_s0 }
  0x28   :  { %p811_p4 = pnand %p809_p3, %p806_p2 }
  0x2a   :  { %814 = shalt.err (!%p811_p4)
}
  0x2b   :  { %s815_s9 = scalar_lea.vmem %s22_s14, 32  ;;  %p820_p6 = scmp.lt.s32.totalorder %s22_s14, %s22_s14 }
  0x2c   :  { %p816_p5 = scmp.ne.s32.totalorder %s22_s14, %s815_s9  ;;  %p821_p7 = scmp.lt.s32.totalorder %s815_s9, %s815_s9 }
  0x2e   :  { %p822_p8 = por %p821_p7, %p820_p6 }
  0x30   :  { %p823_p9 = pnand %p822_p8, %p816_p5 }
  0x32   :  { %826 = shalt.err (!%p823_p9)
}
  0x33   :  { %24 = dma.hbm_to_vmem [thread:$0]  %s1082_s0, 32, %s22_s14, [#allocation3]  }
  0x34   :  { %s906_s11 = smov [#allocation7]   ;;  %s907_s13 = smov [#allocation10]  }
  0x35   :  { %s42_s12 = sshll.u32 %s906_s11, 4  ;;  %s66_s15 = sshll.u32 %s907_s13, 4  ;;  %s43_s12 = int_to_ptr.vmem [resolvable:$true] %s42_s12  ;;  %s67_s15 = int_to_ptr.vmem [resolvable:$true] %s66_s15 }
  0x36   :  { %s827_s18 = scalar_lea.hbm %s1084_s2, 1024 }
  0x37   :  { %p828_p10 = scmp.ne.s32.totalorder %s1084_s2, %s827_s18  ;;  %p831_p11 = scmp.lt.u32.totalorder %s827_s18, %s1084_s2 }
  0x39   :  { %p833_p12 = pnand %p831_p11, %p828_p10 }
  0x3b   :  { %836 = shalt.err (!%p833_p12)
}
  0x3c   :  { %s837_s0 = scalar_lea.vmem %s43_s12, 1024  ;;  %p842_p0 = scmp.lt.s32.totalorder %s43_s12, %s43_s12 }
  0x3d   :  { %p838_p13 = scmp.ne.s32.totalorder %s43_s12, %s837_s0  ;;  %p843_p1 = scmp.lt.s32.totalorder %s837_s0, %s837_s0 }
  0x3f   :  { %p844_p2 = por %p843_p1, %p842_p0 }
  0x41   :  { %p845_p3 = pnand %p844_p2, %p838_p13 }
  0x43   :  { %848 = shalt.err (!%p845_p3)
}
  0x44   :  { %48 = dma.hbm_to_vmem [thread:$0]  %s1084_s2, 1024, %s43_s12, [#allocation6], %s902_s7, %s902_s7, %s903_s8  }
  0x45   :  { %s849_s25 = scalar_lea.hbm %s1086_s4, 1024 }
  0x46   :  { %p850_p4 = scmp.ne.s32.totalorder %s1086_s4, %s849_s25  ;;  %p853_p5 = scmp.lt.u32.totalorder %s849_s25, %s1086_s4 }
  0x48   :  { %p855_p6 = pnand %p853_p5, %p850_p4 }
  0x4a   :  { %858 = shalt.err (!%p855_p6)
}
  0x4b   :  { %s859_s30 = scalar_lea.vmem %s67_s15, 1024  ;;  %p864_p8 = scmp.lt.s32.totalorder %s67_s15, %s67_s15 }
  0x4c   :  { %p860_p7 = scmp.ne.s32.totalorder %s67_s15, %s859_s30  ;;  %p865_p9 = scmp.lt.s32.totalorder %s859_s30, %s859_s30 }
  0x4e   :  { %p866_p10 = por %p865_p9, %p864_p8 }
  0x50   :  { %p867_p11 = pnand %p866_p10, %p860_p7 }
  0x52   :  { %870 = shalt.err (!%p867_p11)
}
  0x53   :  { %72 = dma.hbm_to_vmem [thread:$0]  %s1086_s4, 1024, %s67_s15, [#allocation9], %s902_s7, %s902_s7, %s903_s8  }
  0x54   :  { %893 = dma.done.wait [#allocation3], 32  }
  0x55   :  { %894 = vsyncadd [#allocation3], 4294967264 }
  0x56   :  { %895 = dma.done.wait [#allocation6], 2048  }
  0x57   :  { %896 = vsyncadd [#allocation6], 4294965248 }
  0x58   :  { %897 = dma.done.wait [#allocation9], 2048  }
  0x59   :  { %898 = vsyncadd [#allocation9], 4294965248  ;;  %v908_v0 = vmov 0.0   ;;  %vm909_vm0 = vmmov 0   ;;  %v727_v1 = vld [vmem:[#allocation5] sm:$0xff]   ;;  %v728_v2 = vld [vmem:[#allocation5 + $0x8] sm:$0xff]  }
  0x5a   :  { %637 = vmatprep.subr.bf16.mxu0 %v908_v0  ;;  %653 = vmatprep.mubr.msk.bf16.mxu0 %vm909_vm0, %v908_v0  ;;  %v729_v3 = vld [vmem:[#allocation5 + $0x10] sm:$0xff]   ;;  %v735_v4 = vld [vmem:[#allocation7] sm:$0xff]   ;;  %v730_v5 = vld [vmem:[#allocation5 + $0x18] sm:$0xff]   ;;  %vm93_vm1 = vcmask 130048   ;;  %s910_s15 = smov [#allocation11]   ;;  %vm545_vm2 = vcmask 25600  }
  0x5b   :  { %657 = vmatprep.subr.bf16.mxu1 %v908_v0  ;;  %673 = vmatprep.mubr.msk.bf16.mxu1 %vm909_vm0, %v908_v0  ;;  %v736_v6 = vld [vmem:[#allocation7 + $0x8] sm:$0xff]   ;;  %v731_v7 = vld [vmem:[#allocation5 + $0x20] sm:$0xff]   ;;  %v737_v8 = vld [vmem:[#allocation7 + $0x10] sm:$0xff]   ;;  %s553_s16 = sshll.u32 %s910_s15, 4  ;;  %s554_s16 = int_to_ptr.vmem [resolvable:$true] %s553_s16 }
  0x5c   :  { %638 = vmatpush3.bf16.msra.mxu0 %v727_v1  ;;  %658 = vmatpush3.bf16.msra.mxu1 %v735_v4  ;;  %v732_v9 = vld [vmem:[#allocation5 + $0x28] sm:$0xff]   ;;  %v738_v10 = vld [vmem:[#allocation7 + $0x18] sm:$0xff]   ;;  %v733_v11 = vld [vmem:[#allocation5 + $0x30] sm:$0xff]   ;;  %s871_s17 = scalar_lea.vmem %s554_s16, 32  ;;  %p876_p13 = scmp.lt.s32.totalorder %s554_s16, %s554_s16 }
  0x5d   :  { %639 = vmatprep.subr.bf16.mxu0 %v908_v0  ;;  %659 = vmatprep.subr.bf16.mxu1 %v908_v0  ;;  %v739_v12 = vld [vmem:[#allocation7 + $0x20] sm:$0xff]   ;;  %v734_v13 = vld [vmem:[#allocation5 + $0x38] sm:$0xff]   ;;  %v740_v15 = vld [vmem:[#allocation7 + $0x28] sm:$0xff]   ;;  %p872_p12 = scmp.ne.s32.totalorder %s554_s16, %s871_s17  ;;  %p877_p0 = scmp.lt.s32.totalorder %s871_s17, %s871_s17 }
  0x5e   :  { %v91_v14 = vld [vmem:[#allocation2] sm:$0x3]  ;;  %v741_v17 = vld [vmem:[#allocation7 + $0x30] sm:$0xff]   ;;  %v743_v19 = vld [vmem:[#allocation8] sm:$0xff]  }
  0x5f   :  { %v92_v16 = vpack.c.bf16 %v91_v14, %v91_v14  ;;  %v742_v18 = vld [vmem:[#allocation7 + $0x38] sm:$0xff]   ;;  %v744_v20 = vld [vmem:[#allocation8 + $0x8] sm:$0xff]   ;;  %v745_v21 = vld [vmem:[#allocation8 + $0x10] sm:$0xff]   ;;  %p878_p1 = por %p877_p0, %p876_p13 }
  0x60   :  { %640 = vmatpush3.bf16.msra.mxu0 %v728_v2  ;;  %660 = vmatpush3.bf16.msra.mxu1 %v736_v6  ;;  %v746_v22 = vld [vmem:[#allocation8 + $0x18] sm:$0xff]   ;;  %v747_v23 = vld [vmem:[#allocation8 + $0x20] sm:$0xff]   ;;  %v748_v24 = vld [vmem:[#allocation8 + $0x28] sm:$0xff]  }
  0x61   :  { %641 = vmatprep.subr.bf16.mxu0 %v908_v0  ;;  %661 = vmatprep.subr.bf16.mxu1 %v908_v0  ;;  %v564_v25 = vld [vmem:[%s1087_s5] ss:$0 sm:$0xff]  ;;  %v750_v34 = vld [vmem:[#allocation8 + $0x38] sm:$0xff]   ;;  %v751_v35 = vld [vmem:[#allocation10] sm:$0xff]   ;;  %p879_p2 = pnand %p878_p1, %p872_p12 }
  0x62   :  { %v749_v33 = vld [vmem:[#allocation8 + $0x30] sm:$0xff]   ;;  %v752_v36 = vld [vmem:[#allocation10 + $0x8] sm:$0xff]   ;;  %v754_v38 = vld [vmem:[#allocation10 + $0x18] sm:$0xff]  }
  0x63   :  { %v753_v37 = vld [vmem:[#allocation10 + $0x10] sm:$0xff]   ;;  %v755_v47 = vld [vmem:[#allocation10 + $0x20] sm:$0xff]   ;;  %v756_v48 = vld [vmem:[#allocation10 + $0x28] sm:$0xff]  }
  0x64   :  { %642 = vmatpush3.bf16.msra.mxu0 %v729_v3  ;;  %662 = vmatpush3.bf16.msra.mxu1 %v737_v8  ;;  %v574_v39 = vld [vmem:[%s1087_s5 + $0x1] ss:$0 sm:$0xff]  ;;  %v758_v50 = vld [vmem:[#allocation10 + $0x38] sm:$0xff]  }
  0x65   :  { %643 = vmatprep.subr.bf16.mxu0 %v908_v0  ;;  %663 = vmatprep.subr.bf16.mxu1 %v908_v0  ;;  %v757_v49 = vld [vmem:[#allocation10 + $0x30] sm:$0xff]   ;;  %v583_v51 = vld [vmem:[%s1087_s5 + $0x2] ss:$0 sm:$0xff]  ;;  %v592_v63 = vld [vmem:[%s1087_s5 + $0x3] ss:$0 sm:$0xff] }
  0x68   :  { %644 = vmatpush3.bf16.msra.mxu0 %v730_v5  ;;  %664 = vmatpush3.bf16.msra.mxu1 %v738_v10 }
  0x69   :  { %645 = vmatprep.subr.bf16.mxu0 %v908_v0  ;;  %665 = vmatprep.subr.bf16.mxu1 %v908_v0 }
  0x6c   :  { %646 = vmatpush3.bf16.msra.mxu0 %v731_v7  ;;  %666 = vmatpush3.bf16.msra.mxu1 %v739_v12 }
  0x6d   :  { %647 = vmatprep.subr.bf16.mxu0 %v908_v0  ;;  %667 = vmatprep.subr.bf16.mxu1 %v908_v0 }
  0x70   :  { %648 = vmatpush3.bf16.msra.mxu0 %v732_v9  ;;  %668 = vmatpush3.bf16.msra.mxu1 %v740_v15 }
  0x71   :  { %649 = vmatprep.subr.bf16.mxu0 %v908_v0  ;;  %669 = vmatprep.subr.bf16.mxu1 %v908_v0 }
  0x74   :  { %650 = vmatpush3.bf16.msra.mxu0 %v733_v11  ;;  %670 = vmatpush3.bf16.msra.mxu1 %v741_v17 }
  0x75   :  { %651 = vmatprep.subr.bf16.mxu0 %v908_v0  ;;  %671 = vmatprep.subr.bf16.mxu1 %v908_v0 }
  0x78   :  { %652 = vmatpush3.bf16.msra.mxu0 %v734_v13  ;;  %672 = vmatpush3.bf16.msra.mxu1 %v742_v18 }
  0x79   :  { %677 = vmatprep.subr.bf16.mxu0 %v908_v0  ;;  %697 = vmatprep.subr.bf16.mxu1 %v908_v0 }
  0x7b   :  { %654 = vmatmul.mubr.msk.bf16.vlgmr.msra.gmra.mrb[0].mxu0 %vm93_vm1, %v92_v16 }
  0x7c   :  { %693 = vmatprep.mubr.msk.bf16.mxu0 %vm909_vm0, %v908_v0  ;;  %678 = vmatpush3.bf16.msra.mxu0 %v743_v19 }
  0x7d   :  { %679 = vmatprep.subr.bf16.mxu0 %v908_v0 }
  0x80   :  { %680 = vmatpush3.bf16.msra.mxu0 %v744_v20 }
  0x81   :  { %681 = vmatprep.subr.bf16.mxu0 %v908_v0 }
  0x84   :  { %682 = vmatpush3.bf16.msra.mxu0 %v745_v21 }
  0x85   :  { %683 = vmatprep.subr.bf16.mxu0 %v908_v0 }
  0x88   :  { %684 = vmatpush3.bf16.msra.mxu0 %v746_v22 }
  0x89   :  { %685 = vmatprep.subr.bf16.mxu0 %v908_v0 }
  0x8c   :  { %686 = vmatpush3.bf16.msra.mxu0 %v747_v23 }
  0x8d   :  { %687 = vmatprep.subr.bf16.mxu0 %v908_v0 }
  0x90   :  { %688 = vmatpush3.bf16.msra.mxu0 %v748_v24 }
  0x91   :  { %689 = vmatprep.subr.bf16.mxu0 %v908_v0 }
  0x94   :  { %690 = vmatpush3.bf16.msra.mxu0 %v749_v33 }
  0x95   :  { %691 = vmatprep.subr.bf16.mxu0 %v908_v0 }
  0x98   :  { %692 = vmatpush3.bf16.msra.mxu0 %v750_v34 }
 0x14e   :  { %v201_v26 = vpop.f32.mrb[0].mxu0 }
 0x14f   :  { %v202_v27 = vadd.f32 %v564_v25, %v201_v26  ;;  %v655_v28 = vpop.f32.mrb[1].mxu0 }
 0x150   :  { %v204_v29 = vpop.f32.mrb[2].mxu0 }
 0x151   :  { %v207_v30 = vmax.f32 %v202_v27, 0.0  ;;  %v656_v31 = vpop.f32.mrb[3].mxu0 }
 0x153   :  { %v208_v32 = vpack.c.bf16 %v207_v30, %v207_v30 }
 0x155   :  { %674 = vmatmul.mubr.bf16.vlgmr.msra.gmra.mrb[0].mxu1 %v208_v32 }
 0x156   :  { %713 = vmatprep.mubr.msk.bf16.mxu1 %vm909_vm0, %v908_v0  ;;  %698 = vmatpush3.bf16.msra.mxu1 %v751_v35 }
 0x157   :  { %699 = vmatprep.subr.bf16.mxu1 %v908_v0 }
 0x15a   :  { %700 = vmatpush3.bf16.msra.mxu1 %v752_v36 }
 0x15b   :  { %701 = vmatprep.subr.bf16.mxu1 %v908_v0 }
 0x15e   :  { %702 = vmatpush3.bf16.msra.mxu1 %v753_v37 }
 0x15f   :  { %703 = vmatprep.subr.bf16.mxu1 %v908_v0 }
 0x162   :  { %704 = vmatpush3.bf16.msra.mxu1 %v754_v38 }
 0x163   :  { %705 = vmatprep.subr.bf16.mxu1 %v908_v0 }
 0x166   :  { %706 = vmatpush3.bf16.msra.mxu1 %v755_v47 }
 0x167   :  { %707 = vmatprep.subr.bf16.mxu1 %v908_v0 }
 0x16a   :  { %708 = vmatpush3.bf16.msra.mxu1 %v756_v48 }
 0x16b   :  { %709 = vmatprep.subr.bf16.mxu1 %v908_v0 }
 0x16e   :  { %710 = vmatpush3.bf16.msra.mxu1 %v757_v49 }
 0x16f   :  { %711 = vmatprep.subr.bf16.mxu1 %v908_v0 }
 0x172   :  { %712 = vmatpush3.bf16.msra.mxu1 %v758_v50 }
 0x228   :  { %v312_v40 = vpop.f32.mrb[0].mxu1 }
 0x229   :  { %v313_v41 = vadd.f32 %v574_v39, %v312_v40  ;;  %v675_v42 = vpop.f32.mrb[1].mxu1 }
 0x22a   :  { %v315_v43 = vpop.f32.mrb[2].mxu1 }
 0x22b   :  { %v318_v44 = vmax.f32 %v313_v41, 0.0  ;;  %v676_v45 = vpop.f32.mrb[3].mxu1 }
 0x22d   :  { %v319_v46 = vpack.c.bf16 %v318_v44, %v318_v44 }
 0x22f   :  { %694 = vmatmul.mubr.bf16.vlgmr.msra.gmra.mrb[4].mxu0 %v319_v46 }
 0x302   :  { %v423_v52 = vpop.f32.mrb[4].mxu0 }
 0x303   :  { %v424_v53 = vadd.f32 %v583_v51, %v423_v52  ;;  %v695_v54 = vpop.f32.mrb[5].mxu0 }
 0x304   :  { %v426_v55 = vpop.f32.mrb[6].mxu0 }
 0x305   :  { %v429_v56 = vadd.f32 3.0, %v424_v53  ;;  %v696_v57 = vpop.f32.mrb[7].mxu0 }
 0x307   :  { %v430_v58 = vmax.f32 %v429_v56, 0.0 }
 0x309   :  { %v431_v59 = vmin.f32 %v430_v58, 6.0 }
 0x30b   :  { %v432_v60 = vmul.f32 %v431_v59, %v424_v53 }
 0x30d   :  { %v433_v61 = vmul.f32 0.16666667, %v432_v60 }
 0x30f   :  { %v434_v62 = vpack.c.bf16 %v433_v61, %v433_v61 }
 0x311   :  { %714 = vmatmul.mubr.bf16.vlgmr.msra.gmra.mrb[4].mxu1 %v434_v62 }
 0x3e4   :  { %v538_v0 = vpop.f32.mrb[4].mxu1 }
 0x3e5   :  { %v539_v1 = vadd.f32 %v592_v63, %v538_v0  ;;  %v715_v2 = vpop.f32.mrb[5].mxu1 }
 0x3e6   :  { %v541_v3 = vpop.f32.mrb[6].mxu1 }
 0x3e7   :  { %759 = vtanh.f32 %v539_v1  ;;  %v716_v4 = vpop.f32.mrb[7].mxu1 }
 0x3f1   :  { %v760_v5 = vpop.eup %759 }
 0x3f2   :  { %546 = vst.msk [vmem:[#allocation11] sm:$0x3] %vm545_vm2, %v760_v5 }
 0x3f3   :  { %882 = shalt.err (!%p879_p2)
}
 0x3f4   :  { %s883_s19 = scalar_lea.hbm %s1088_s6, 32 }
 0x3f5   :  { %p884_p3 = scmp.ne.s32.totalorder %s1088_s6, %s883_s19  ;;  %p887_p4 = scmp.lt.u32.totalorder %s883_s19, %s1088_s6 }
 0x3f7   :  { %p889_p5 = pnand %p887_p4, %p884_p3 }
 0x3f9   :  { %892 = shalt.err (!%p889_p5)
}
 0x3fa   :  { %556 = dma.vmem_to_hbm [thread:$0]  %s554_s16, 32, %s1088_s6, [#allocation4]  }
 0x3fb   :  { %899 = dma.done.wait [#allocation4], 32  }
 0x3fc   :  { %900 = vsyncadd [#allocation4], 4294967264 }
 0x3fd   :  { %560 = vsyncpa [#allocation3], 1 }
 0x3fe   :  { %561 = vsyncpa [#allocation6], 1 }
 0x3ff   :  { %562 = vsyncpa [#allocation9], 1 }
 0x400   :  { %563 = vsyncpa [#allocation4], 1 }

// kernel: _forward.1
= control target key start
LH: loop header
LB: loop body
LE: loop exit
PB: predicated region body
PF: predicated region fallthrough
CT: control target
= control target key end

     0   :  { %11 = vsyncpa [#allocation3], 0  ;;  %s1082_s0 = inlined_call_operand.hbm [shape: f32[2,16], index: 0, kind: input, shape index: {}]   ;;  %s1083_s1 = inlined_call_operand.hbm [shape: bf16[128,128], index: 1, kind: input, shape index: {}]   ;;  %s1084_s2 = inlined_call_operand.hbm [shape: bf16[128,128], index: 2, kind: input, shape index: {}]   ;;  %s1085_s3 = inlined_call_operand.hbm [shape: bf16[128,128], index: 3, kind: input, shape index: {}]   ;;  %s1086_s4 = inlined_call_operand.hbm [shape: bf16[128,128], index: 4, kind: input, shape index: {}]   ;;  %s1087_s5 = inlined_call_operand.vmem [shape: f32[4,128], index: 5, kind: input, shape index: {}]   ;;  %s1088_s6 = inlined_call_operand.hbm [shape: f32[2,4], index: 6, kind: output, shape index: {}]  }
   0x1   :  { %12 = vsyncpa [#allocation6], 0 }
   0x2   :  { %13 = vsyncpa [#allocation9], 0 }
   0x3   :  { %14 = vsyncpa [#allocation4], 0  ;;  %s901_s21 = smov [#allocation5]   ;;  %s761_s25 = scalar_lea.hbm %s1083_s1, 1024 }
   0x4   :  { %s30_s22 = sshll.u32 %s901_s21, 4  ;;  %p762_p0 = scmp.ne.s32.totalorder %s1083_s1, %s761_s25  ;;  %s31_s22 = int_to_ptr.vmem [resolvable:$true] %s30_s22 }
   0x5   :  { %p765_p1 = scmp.lt.u32.totalorder %s761_s25, %s1083_s1 }
   0x7   :  { %p767_p2 = pnand %p765_p1, %p762_p0 }
   0x9   :  { %770 = shalt.err (!%p767_p2)
}
   0xa   :  { %s771_s30 = scalar_lea.vmem %s31_s22, 1024  ;;  %p776_p4 = scmp.lt.s32.totalorder %s31_s22, %s31_s22 }
   0xb   :  { %p772_p3 = scmp.ne.s32.totalorder %s31_s22, %s771_s30  ;;  %p777_p5 = scmp.lt.s32.totalorder %s771_s30, %s771_s30 }
   0xd   :  { %p778_p6 = por %p777_p5, %p776_p4 }
   0xf   :  { %p779_p7 = pnand %p778_p6, %p772_p3 }
  0x11   :  { %782 = shalt.err (!%p779_p7)
}
  0x12   :  { %s902_s7 = smov 64   ;;  %s903_s8 = smov 4  }
  0x13   :  { %36 = dma.hbm_to_vmem [thread:$0]  %s1083_s1, 1024, %s31_s22, [#allocation6], %s902_s7, %s902_s7, %s903_s8  }
  0x14   :  { %s904_s11 = smov [#allocation8]   ;;  %s905_s13 = smov [#allocation2]  }
  0x15   :  { %s54_s12 = sshll.u32 %s904_s11, 4  ;;  %s21_s14 = sshll.u32 %s905_s13, 4  ;;  %s55_s12 = int_to_ptr.vmem [resolvable:$true] %s54_s12  ;;  %s22_s14 = int_to_ptr.vmem [resolvable:$true] %s21_s14 }
  0x16   :  { %s783_s17 = scalar_lea.hbm %s1085_s3, 1024 }
  0x17   :  { %p784_p8 = scmp.ne.s32.totalorder %s1085_s3, %s783_s17  ;;  %p787_p9 = scmp.lt.u32.totalorder %s783_s17, %s1085_s3 }
  0x19   :  { %p789_p10 = pnand %p787_p9, %p784_p8 }
  0x1b   :  { %792 = shalt.err (!%p789_p10)
}
  0x1c   :  { %s793_s1 = scalar_lea.vmem %s55_s12, 1024  ;;  %p798_p12 = scmp.lt.s32.totalorder %s55_s12, %s55_s12 }
  0x1d   :  { %p794_p11 = scmp.ne.s32.totalorder %s55_s12, %s793_s1  ;;  %p799_p13 = scmp.lt.s32.totalorder %s793_s1, %s793_s1 }
  0x1f   :  { %p800_p0 = por %p799_p13, %p798_p12 }
  0x21   :  { %p801_p1 = pnand %p800_p0, %p794_p11 }
  0x23   :  { %804 = shalt.err (!%p801_p1)
}
  0x24   :  { %60 = dma.hbm_to_vmem [thread:$0]  %s1085_s3, 1024, %s55_s12, [#allocation9], %s902_s7, %s902_s7, %s903_s8  }
  0x25   :  { %s805_s26 = scalar_lea.hbm %s1082_s0, 32 }
  0x26   :  { %p806_p2 = scmp.ne.s32.totalorder %s1082_s0, %s805_s26  ;;  %p809_p3 = scmp.lt.u32.totalorder %s805_s26, %s1082_s0 }
  0x28   :  { %p811_p4 = pnand %p809_p3, %p806_p2 }
  0x2a   :  { %814 = shalt.err (!%p811_p4)
}
  0x2b   :  { %s815_s9 = scalar_lea.vmem %s22_s14, 32  ;;  %p820_p6 = scmp.lt.s32.totalorder %s22_s14, %s22_s14 }
  0x2c   :  { %p816_p5 = scmp.ne.s32.totalorder %s22_s14, %s815_s9  ;;  %p821_p7 = scmp.lt.s32.totalorder %s815_s9, %s815_s9 }
  0x2e   :  { %p822_p8 = por %p821_p7, %p820_p6 }
  0x30   :  { %p823_p9 = pnand %p822_p8, %p816_p5 }
  0x32   :  { %826 = shalt.err (!%p823_p9)
}
  0x33   :  { %24 = dma.hbm_to_vmem [thread:$0]  %s1082_s0, 32, %s22_s14, [#allocation3]  }
  0x34   :  { %s906_s11 = smov [#allocation7]   ;;  %s907_s13 = smov [#allocation10]  }
  0x35   :  { %s42_s12 = sshll.u32 %s906_s11, 4  ;;  %s66_s15 = sshll.u32 %s907_s13, 4  ;;  %s43_s12 = int_to_ptr.vmem [resolvable:$true] %s42_s12  ;;  %s67_s15 = int_to_ptr.vmem [resolvable:$true] %s66_s15 }
  0x36   :  { %s827_s18 = scalar_lea.hbm %s1084_s2, 1024 }
  0x37   :  { %p828_p10 = scmp.ne.s32.totalorder %s1084_s2, %s827_s18  ;;  %p831_p11 = scmp.lt.u32.totalorder %s827_s18, %s1084_s2 }
  0x39   :  { %p833_p12 = pnand %p831_p11, %p828_p10 }
  0x3b   :  { %836 = shalt.err (!%p833_p12)
}
  0x3c   :  { %s837_s0 = scalar_lea.vmem %s43_s12, 1024  ;;  %p842_p0 = scmp.lt.s32.totalorder %s43_s12, %s43_s12 }
  0x3d   :  { %p838_p13 = scmp.ne.s32.totalorder %s43_s12, %s837_s0  ;;  %p843_p1 = scmp.lt.s32.totalorder %s837_s0, %s837_s0 }
  0x3f   :  { %p844_p2 = por %p843_p1, %p842_p0 }
  0x41   :  { %p845_p3 = pnand %p844_p2, %p838_p13 }
  0x43   :  { %848 = shalt.err (!%p845_p3)
}
  0x44   :  { %48 = dma.hbm_to_vmem [thread:$0]  %s1084_s2, 1024, %s43_s12, [#allocation6], %s902_s7, %s902_s7, %s903_s8  }
  0x45   :  { %s849_s25 = scalar_lea.hbm %s1086_s4, 1024 }
  0x46   :  { %p850_p4 = scmp.ne.s32.totalorder %s1086_s4, %s849_s25  ;;  %p853_p5 = scmp.lt.u32.totalorder %s849_s25, %s1086_s4 }
  0x48   :  { %p855_p6 = pnand %p853_p5, %p850_p4 }
  0x4a   :  { %858 = shalt.err (!%p855_p6)
}
  0x4b   :  { %s859_s30 = scalar_lea.vmem %s67_s15, 1024  ;;  %p864_p8 = scmp.lt.s32.totalorder %s67_s15, %s67_s15 }
  0x4c   :  { %p860_p7 = scmp.ne.s32.totalorder %s67_s15, %s859_s30  ;;  %p865_p9 = scmp.lt.s32.totalorder %s859_s30, %s859_s30 }
  0x4e   :  { %p866_p10 = por %p865_p9, %p864_p8 }
  0x50   :  { %p867_p11 = pnand %p866_p10, %p860_p7 }
  0x52   :  { %870 = shalt.err (!%p867_p11)
}
  0x53   :  { %72 = dma.hbm_to_vmem [thread:$0]  %s1086_s4, 1024, %s67_s15, [#allocation9], %s902_s7, %s902_s7, %s903_s8  }
  0x54   :  { %893 = dma.done.wait [#allocation3], 32  }
  0x55   :  { %894 = vsyncadd [#allocation3], 4294967264 }
  0x56   :  { %895 = dma.done.wait [#allocation6], 2048  }
  0x57   :  { %896 = vsyncadd [#allocation6], 4294965248 }
  0x58   :  { %897 = dma.done.wait [#allocation9], 2048  }
  0x59   :  { %898 = vsyncadd [#allocation9], 4294965248  ;;  %v908_v0 = vmov 0.0   ;;  %vm909_vm0 = vmmov 0   ;;  %v727_v1 = vld [vmem:[#allocation5] sm:$0xff]   ;;  %v728_v2 = vld [vmem:[#allocation5 + $0x8] sm:$0xff]  }
  0x5a   :  { %637 = vmatprep.subr.bf16.mxu0 %v908_v0  ;;  %653 = vmatprep.mubr.msk.bf16.mxu0 %vm909_vm0, %v908_v0  ;;  %v729_v3 = vld [vmem:[#allocation5 + $0x10] sm:$0xff]   ;;  %v735_v4 = vld [vmem:[#allocation7] sm:$0xff]   ;;  %v730_v5 = vld [vmem:[#allocation5 + $0x18] sm:$0xff]   ;;  %vm93_vm1 = vcmask 130048   ;;  %s910_s15 = smov [#allocation11]   ;;  %vm545_vm2 = vcmask 25600  }
  0x5b   :  { %657 = vmatprep.subr.bf16.mxu1 %v908_v0  ;;  %673 = vmatprep.mubr.msk.bf16.mxu1 %vm909_vm0, %v908_v0  ;;  %v736_v6 = vld [vmem:[#allocation7 + $0x8] sm:$0xff]   ;;  %v731_v7 = vld [vmem:[#allocation5 + $0x20] sm:$0xff]   ;;  %v737_v8 = vld [vmem:[#allocation7 + $0x10] sm:$0xff]   ;;  %s553_s16 = sshll.u32 %s910_s15, 4  ;;  %s554_s16 = int_to_ptr.vmem [resolvable:$true] %s553_s16 }
  0x5c   :  { %638 = vmatpush3.bf16.msra.mxu0 %v727_v1  ;;  %658 = vmatpush3.bf16.msra.mxu1 %v735_v4  ;;  %v732_v9 = vld [vmem:[#allocation5 + $0x28] sm:$0xff]   ;;  %v738_v10 = vld [vmem:[#allocation7 + $0x18] sm:$0xff]   ;;  %v733_v11 = vld [vmem:[#allocation5 + $0x30] sm:$0xff]   ;;  %s871_s17 = scalar_lea.vmem %s554_s16, 32  ;;  %p876_p13 = scmp.lt.s32.totalorder %s554_s16, %s554_s16 }
  0x5d   :  { %639 = vmatprep.subr.bf16.mxu0 %v908_v0  ;;  %659 = vmatprep.subr.bf16.mxu1 %v908_v0  ;;  %v739_v12 = vld [vmem:[#allocation7 + $0x20] sm:$0xff]   ;;  %v734_v13 = vld [vmem:[#allocation5 + $0x38] sm:$0xff]   ;;  %v740_v15 = vld [vmem:[#allocation7 + $0x28] sm:$0xff]   ;;  %p872_p12 = scmp.ne.s32.totalorder %s554_s16, %s871_s17  ;;  %p877_p0 = scmp.lt.s32.totalorder %s871_s17, %s871_s17 }
  0x5e   :  { %v91_v14 = vld [vmem:[#allocation2] sm:$0x3]  ;;  %v741_v17 = vld [vmem:[#allocation7 + $0x30] sm:$0xff]   ;;  %v743_v19 = vld [vmem:[#allocation8] sm:$0xff]  }
  0x5f   :  { %v92_v16 = vpack.c.bf16 %v91_v14, %v91_v14  ;;  %v742_v18 = vld [vmem:[#allocation7 + $0x38] sm:$0xff]   ;;  %v744_v20 = vld [vmem:[#allocation8 + $0x8] sm:$0xff]   ;;  %v745_v21 = vld [vmem:[#allocation8 + $0x10] sm:$0xff]   ;;  %p878_p1 = por %p877_p0, %p876_p13 }
  0x60   :  { %640 = vmatpush3.bf16.msra.mxu0 %v728_v2  ;;  %660 = vmatpush3.bf16.msra.mxu1 %v736_v6  ;;  %v746_v22 = vld [vmem:[#allocation8 + $0x18] sm:$0xff]   ;;  %v747_v23 = vld [vmem:[#allocation8 + $0x20] sm:$0xff]   ;;  %v748_v24 = vld [vmem:[#allocation8 + $0x28] sm:$0xff]  }
  0x61   :  { %641 = vmatprep.subr.bf16.mxu0 %v908_v0  ;;  %661 = vmatprep.subr.bf16.mxu1 %v908_v0  ;;  %v564_v25 = vld [vmem:[%s1087_s5] ss:$0 sm:$0xff]  ;;  %v750_v34 = vld [vmem:[#allocation8 + $0x38] sm:$0xff]   ;;  %v751_v35 = vld [vmem:[#allocation10] sm:$0xff]   ;;  %p879_p2 = pnand %p878_p1, %p872_p12 }
  0x62   :  { %v749_v33 = vld [vmem:[#allocation8 + $0x30] sm:$0xff]   ;;  %v752_v36 = vld [vmem:[#allocation10 + $0x8] sm:$0xff]   ;;  %v754_v38 = vld [vmem:[#allocation10 + $0x18] sm:$0xff]  }
  0x63   :  { %v753_v37 = vld [vmem:[#allocation10 + $0x10] sm:$0xff]   ;;  %v755_v47 = vld [vmem:[#allocation10 + $0x20] sm:$0xff]   ;;  %v756_v48 = vld [vmem:[#allocation10 + $0x28] sm:$0xff]  }
  0x64   :  { %642 = vmatpush3.bf16.msra.mxu0 %v729_v3  ;;  %662 = vmatpush3.bf16.msra.mxu1 %v737_v8  ;;  %v574_v39 = vld [vmem:[%s1087_s5 + $0x1] ss:$0 sm:$0xff]  ;;  %v758_v50 = vld [vmem:[#allocation10 + $0x38] sm:$0xff]  }
  0x65   :  { %643 = vmatprep.subr.bf16.mxu0 %v908_v0  ;;  %663 = vmatprep.subr.bf16.mxu1 %v908_v0  ;;  %v757_v49 = vld [vmem:[#allocation10 + $0x30] sm:$0xff]   ;;  %v583_v51 = vld [vmem:[%s1087_s5 + $0x2] ss:$0 sm:$0xff]  ;;  %v592_v63 = vld [vmem:[%s1087_s5 + $0x3] ss:$0 sm:$0xff] }
  0x68   :  { %644 = vmatpush3.bf16.msra.mxu0 %v730_v5  ;;  %664 = vmatpush3.bf16.msra.mxu1 %v738_v10 }
  0x69   :  { %645 = vmatprep.subr.bf16.mxu0 %v908_v0  ;;  %665 = vmatprep.subr.bf16.mxu1 %v908_v0 }
  0x6c   :  { %646 = vmatpush3.bf16.msra.mxu0 %v731_v7  ;;  %666 = vmatpush3.bf16.msra.mxu1 %v739_v12 }
  0x6d   :  { %647 = vmatprep.subr.bf16.mxu0 %v908_v0  ;;  %667 = vmatprep.subr.bf16.mxu1 %v908_v0 }
  0x70   :  { %648 = vmatpush3.bf16.msra.mxu0 %v732_v9  ;;  %668 = vmatpush3.bf16.msra.mxu1 %v740_v15 }
  0x71   :  { %649 = vmatprep.subr.bf16.mxu0 %v908_v0  ;;  %669 = vmatprep.subr.bf16.mxu1 %v908_v0 }
  0x74   :  { %650 = vmatpush3.bf16.msra.mxu0 %v733_v11  ;;  %670 = vmatpush3.bf16.msra.mxu1 %v741_v17 }
  0x75   :  { %651 = vmatprep.subr.bf16.mxu0 %v908_v0  ;;  %671 = vmatprep.subr.bf16.mxu1 %v908_v0 }
  0x78   :  { %652 = vmatpush3.bf16.msra.mxu0 %v734_v13  ;;  %672 = vmatpush3.bf16.msra.mxu1 %v742_v18 }
  0x79   :  { %677 = vmatprep.subr.bf16.mxu0 %v908_v0  ;;  %697 = vmatprep.subr.bf16.mxu1 %v908_v0 }
  0x7b   :  { %654 = vmatmul.mubr.msk.bf16.vlgmr.msra.gmra.mrb[0].mxu0 %vm93_vm1, %v92_v16 }
  0x7c   :  { %693 = vmatprep.mubr.msk.bf16.mxu0 %vm909_vm0, %v908_v0  ;;  %678 = vmatpush3.bf16.msra.mxu0 %v743_v19 }
  0x7d   :  { %679 = vmatprep.subr.bf16.mxu0 %v908_v0 }
  0x80   :  { %680 = vmatpush3.bf16.msra.mxu0 %v744_v20 }
  0x81   :  { %681 = vmatprep.subr.bf16.mxu0 %v908_v0 }
  0x84   :  { %682 = vmatpush3.bf16.msra.mxu0 %v745_v21 }
  0x85   :  { %683 = vmatprep.subr.bf16.mxu0 %v908_v0 }
  0x88   :  { %684 = vmatpush3.bf16.msra.mxu0 %v746_v22 }
  0x89   :  { %685 = vmatprep.subr.bf16.mxu0 %v908_v0 }
  0x8c   :  { %686 = vmatpush3.bf16.msra.mxu0 %v747_v23 }
  0x8d   :  { %687 = vmatprep.subr.bf16.mxu0 %v908_v0 }
  0x90   :  { %688 = vmatpush3.bf16.msra.mxu0 %v748_v24 }
  0x91   :  { %689 = vmatprep.subr.bf16.mxu0 %v908_v0 }
  0x94   :  { %690 = vmatpush3.bf16.msra.mxu0 %v749_v33 }
  0x95   :  { %691 = vmatprep.subr.bf16.mxu0 %v908_v0 }
  0x98   :  { %692 = vmatpush3.bf16.msra.mxu0 %v750_v34 }
 0x14e   :  { %v201_v26 = vpop.f32.mrb[0].mxu0 }
 0x14f   :  { %v202_v27 = vadd.f32 %v564_v25, %v201_v26  ;;  %v655_v28 = vpop.f32.mrb[1].mxu0 }
 0x150   :  { %v204_v29 = vpop.f32.mrb[2].mxu0 }
 0x151   :  { %v207_v30 = vmax.f32 %v202_v27, 0.0  ;;  %v656_v31 = vpop.f32.mrb[3].mxu0 }
 0x153   :  { %v208_v32 = vpack.c.bf16 %v207_v30, %v207_v30 }
 0x155   :  { %674 = vmatmul.mubr.bf16.vlgmr.msra.gmra.mrb[0].mxu1 %v208_v32 }
 0x156   :  { %713 = vmatprep.mubr.msk.bf16.mxu1 %vm909_vm0, %v908_v0  ;;  %698 = vmatpush3.bf16.msra.mxu1 %v751_v35 }
 0x157   :  { %699 = vmatprep.subr.bf16.mxu1 %v908_v0 }
 0x15a   :  { %700 = vmatpush3.bf16.msra.mxu1 %v752_v36 }
 0x15b   :  { %701 = vmatprep.subr.bf16.mxu1 %v908_v0 }
 0x15e   :  { %702 = vmatpush3.bf16.msra.mxu1 %v753_v37 }
 0x15f   :  { %703 = vmatprep.subr.bf16.mxu1 %v908_v0 }
 0x162   :  { %704 = vmatpush3.bf16.msra.mxu1 %v754_v38 }
 0x163   :  { %705 = vmatprep.subr.bf16.mxu1 %v908_v0 }
 0x166   :  { %706 = vmatpush3.bf16.msra.mxu1 %v755_v47 }
 0x167   :  { %707 = vmatprep.subr.bf16.mxu1 %v908_v0 }
 0x16a   :  { %708 = vmatpush3.bf16.msra.mxu1 %v756_v48 }
 0x16b   :  { %709 = vmatprep.subr.bf16.mxu1 %v908_v0 }
 0x16e   :  { %710 = vmatpush3.bf16.msra.mxu1 %v757_v49 }
 0x16f   :  { %711 = vmatprep.subr.bf16.mxu1 %v908_v0 }
 0x172   :  { %712 = vmatpush3.bf16.msra.mxu1 %v758_v50 }
 0x228   :  { %v312_v40 = vpop.f32.mrb[0].mxu1 }
 0x229   :  { %v313_v41 = vadd.f32 %v574_v39, %v312_v40  ;;  %v675_v42 = vpop.f32.mrb[1].mxu1 }
 0x22a   :  { %v315_v43 = vpop.f32.mrb[2].mxu1 }
 0x22b   :  { %v318_v44 = vmax.f32 %v313_v41, 0.0  ;;  %v676_v45 = vpop.f32.mrb[3].mxu1 }
 0x22d   :  { %v319_v46 = vpack.c.bf16 %v318_v44, %v318_v44 }
 0x22f   :  { %694 = vmatmul.mubr.bf16.vlgmr.msra.gmra.mrb[4].mxu0 %v319_v46 }
 0x302   :  { %v423_v52 = vpop.f32.mrb[4].mxu0 }
 0x303   :  { %v424_v53 = vadd.f32 %v583_v51, %v423_v52  ;;  %v695_v54 = vpop.f32.mrb[5].mxu0 }
 0x304   :  { %v426_v55 = vpop.f32.mrb[6].mxu0 }
 0x305   :  { %v429_v56 = vadd.f32 3.0, %v424_v53  ;;  %v696_v57 = vpop.f32.mrb[7].mxu0 }
 0x307   :  { %v430_v58 = vmax.f32 %v429_v56, 0.0 }
 0x309   :  { %v431_v59 = vmin.f32 %v430_v58, 6.0 }
 0x30b   :  { %v432_v60 = vmul.f32 %v431_v59, %v424_v53 }
 0x30d   :  { %v433_v61 = vmul.f32 0.16666667, %v432_v60 }
 0x30f   :  { %v434_v62 = vpack.c.bf16 %v433_v61, %v433_v61 }
 0x311   :  { %714 = vmatmul.mubr.bf16.vlgmr.msra.gmra.mrb[4].mxu1 %v434_v62 }
 0x3e4   :  { %v538_v0 = vpop.f32.mrb[4].mxu1 }
 0x3e5   :  { %v539_v1 = vadd.f32 %v592_v63, %v538_v0  ;;  %v715_v2 = vpop.f32.mrb[5].mxu1 }
 0x3e6   :  { %v541_v3 = vpop.f32.mrb[6].mxu1 }
 0x3e7   :  { %759 = vtanh.f32 %v539_v1  ;;  %v716_v4 = vpop.f32.mrb[7].mxu1 }
 0x3f1   :  { %v760_v5 = vpop.eup %759 }
 0x3f2   :  { %546 = vst.msk [vmem:[#allocation11] sm:$0x3] %vm545_vm2, %v760_v5 }
 0x3f3   :  { %882 = shalt.err (!%p879_p2)
}
 0x3f4   :  { %s883_s19 = scalar_lea.hbm %s1088_s6, 32 }
 0x3f5   :  { %p884_p3 = scmp.ne.s32.totalorder %s1088_s6, %s883_s19  ;;  %p887_p4 = scmp.lt.u32.totalorder %s883_s19, %s1088_s6 }
 0x3f7   :  { %p889_p5 = pnand %p887_p4, %p884_p3 }
 0x3f9   :  { %892 = shalt.err (!%p889_p5)
}
 0x3fa   :  { %556 = dma.vmem_to_hbm [thread:$0]  %s554_s16, 32, %s1088_s6, [#allocation4]  }
 0x3fb   :  { %899 = dma.done.wait [#allocation4], 32  }
 0x3fc   :  { %900 = vsyncadd [#allocation4], 4294967264 }
 0x3fd   :  { %560 = vsyncpa [#allocation3], 1 }
 0x3fe   :  { %561 = vsyncpa [#allocation6], 1 }
 0x3ff   :  { %562 = vsyncpa [#allocation9], 1 }
 0x400   :  { %563 = vsyncpa [#allocation4], 1 }

</bundles_post_ra>
